<compile_context>
chip_gen: v5e
topology: v5e:2x2
jax: 0.10.0
libtpu: 0.0.40
codegen_flags: <defaults>
</compile_context>

<pallas_src>
import numpy as np

import jax
import jax.numpy as jnp
from jax.experimental import pallas as pl
from jax.experimental.pallas import tpu as pltpu

BATCH = 2
STATE_DIM = 4


def _round_up(x, m):
    return ((x + m - 1) // m) * m


def _monomial_pairs(d):
    """Degree-<=2 monomials over the augmented vector z = [1, x_1, ..., x_d].

    phi_k(x) = z_i * z_j for 0 <= i <= j <= d (constant, linear, quadratic terms).
    """
    return [(i, j) for i in range(d + 1) for j in range(i, d + 1)]


class SyntheticKoopmanTensor:
    """Deterministic stand-in for the Koopman tensor consumed by the module."""

    def __init__(self, state_dim, n_samples=10):
        self.state_dim = state_dim
        self.pairs = _monomial_pairs(state_dim)
        # Phi_X: (phi_state_dim, n_samples) observables of a deterministic sample set.
        xs = jnp.linspace(-1.0, 1.0, state_dim * n_samples, dtype=jnp.float32)
        self.Phi_X = self.phi(xs.reshape(state_dim, n_samples))

    def phi(self, x_cols):
        # x_cols: (state_dim, batch) -> (phi_state_dim, batch). Pure-JAX reference.
        d, b = x_cols.shape
        z = jnp.concatenate([jnp.ones((1, b), x_cols.dtype), x_cols], axis=0)
        return jnp.stack([z[i] * z[j] for (i, j) in self.pairs], axis=0)


def _soft_koopman_v_kernel(q_ref, x_ref, o_ref):
    """Pure-VPU evaluation of the folded quadratic form, batch on lanes.

    q_ref: (d+1, d+1) f32 SMEM  -- upper-triangular folded weights
                                    (Q'[i,j] quad, Q'[i,d] linear, Q'[d,d] const)
    x_ref: (d, TB)    f32 VMEM  -- state transposed, batch maps to lanes
    o_ref: (1, TB)    f32 VMEM  -- lane-dense value output
    """
    d, tb = x_ref.shape
    x = x_ref[...]                                             # (d, TB) f32
    acc = jnp.full((1, tb), q_ref[d, d], dtype=jnp.float32)    # constant term
    for i in range(d):                                         # fully unrolled (d small)
        xi = x[i:i + 1, :]                                     # (1, TB)
        acc = acc + q_ref[i, d] * xi                           # linear term
        for j in range(i, d):
            acc = acc + (q_ref[i, j] * xi) * x[j:j + 1, :]     # quadratic term
    o_ref[...] = acc


def soft_koopman_v_forward(state, weight, koopman, *, tile_b=512):
    """state: (B, state_dim) f32; weight: (1, phi_state_dim) f32 (nn.Linear layout)."""
    b, d = state.shape
    phi_dim = len(koopman.pairs)
    assert weight.shape == (1, phi_dim)

    # ---- host-side parameter folding: one vectorized scatter-add ------------
    # Monomial k uses augmented indices (i, j) over z = [1, x_1..x_d]; remap the
    # constant slot 0 -> d and x_k -> k-1, then sort so Q' is upper-triangular.
    pairs = np.asarray(koopman.pairs, dtype=np.int64)                  # (phi_dim, 2)
    ii = np.where(pairs[:, 0] == 0, d, pairs[:, 0] - 1)
    jj = np.where(pairs[:, 1] == 0, d, pairs[:, 1] - 1)
    lo, hi = np.minimum(ii, jj), np.maximum(ii, jj)
    q_aug = (jnp.zeros((d + 1, d + 1), jnp.float32)
             .at[lo, hi].add(weight[0].astype(jnp.float32)))           # (d+1, d+1)

    # ---- lane-dense batch layout: batch on lanes, padded to the tile --------
    b_pad = _round_up(b, 128)
    tb = tile_b if b_pad >= tile_b else b_pad
    b_pad = _round_up(b_pad, tb)
    x_t = jnp.pad(state.T.astype(jnp.float32), ((0, 0), (0, b_pad - b)))  # (d, b_pad)

    out = pl.pallas_call(
        _soft_koopman_v_kernel,
        out_shape=jax.ShapeDtypeStruct((1, b_pad), jnp.float32),
        grid=(b_pad // tb,),
        in_specs=[
            pl.BlockSpec(memory_space=pltpu.MemorySpace.SMEM),   # folded weights (whole)
            pl.BlockSpec((d, tb), lambda i: (0, i)),             # state tile, batch on lanes
        ],
        out_specs=pl.BlockSpec((1, tb), lambda i: (0, i)),       # lane-dense output slab
        compiler_params=pltpu.CompilerParams(
            dimension_semantics=("parallel",)),
    )(q_aug, x_t)

    return out[0, :b].reshape(b, 1)


if __name__ == "__main__":
    key = jax.random.PRNGKey(0)
    k_state, k_w = jax.random.split(key)

    kt = SyntheticKoopmanTensor(STATE_DIM)
    phi_dim = kt.Phi_X.shape[0]           # == self.phi_state_dim in the module (15)

    state = jax.random.normal(k_state, (BATCH, STATE_DIM), dtype=jnp.float32)
    # nn.Linear(phi_dim, 1, bias=False): weight (1, phi_dim), U(-1/sqrt(fan_in), +).
    bound = 1.0 / (phi_dim ** 0.5)
    weight = jax.random.uniform(k_w, (1, phi_dim), jnp.float32, -bound, bound)

    out = jax.block_until_ready(soft_koopman_v_forward(state, weight, kt))

    # Pure-JAX reference mirroring the PyTorch forward literally.
    phi_xs = kt.phi(state.T).T            # (B, phi_dim)
    ref = phi_xs @ weight.T               # (B, 1)

    assert out.shape == (BATCH, 1) and out.dtype == jnp.float32
    assert jnp.allclose(out, ref, atol=1e-5, rtol=1e-5), (out, ref)
    print("KERNEL_OK")
</pallas_src>

<mosaic_0001>
module attributes {stable_mosaic.version = 11 : i64} {
  func.func @_soft_koopman_v_kernel(%arg0: i32, %arg1: memref<5x5xf32, #tpu.memory_space<smem>>, %arg2: memref<4x128xf32, #tpu.memory_space<vmem>>, %arg3: memref<1x128xf32, #tpu.memory_space<vmem>>) attributes {dimension_semantics = [#tpu.dimension_semantics<parallel>], iteration_bounds = array<i64: 1>, scalar_prefetch = 0 : i64, scratch_operands = 0 : i64, tpu.core_type = #tpu.core_type<tc>, window_params = [{transform_indices = @transform_0, window_bounds = array<i64: 5, 5>}, {transform_indices = @transform_1, window_bounds = array<i64: 4, 128>}, {transform_indices = @transform_2, window_bounds = array<i64: 1, 128>}]} {
    %c0 = arith.constant 0 : index
    %c0_0 = arith.constant 0 : index
    %0 = vector.load %arg2[%c0, %c0_0] : memref<4x128xf32, #tpu.memory_space<vmem>>, vector<4x128xf32>
    %c4 = arith.constant 4 : index
    %c4_1 = arith.constant 4 : index
    %1 = memref.load %arg1[%c4, %c4_1] : memref<5x5xf32, #tpu.memory_space<smem>>
    %2 = vector.broadcast %1 : f32 to vector<1x128xf32>
    %3 = vector.extract_strided_slice %0 {offsets = [0, 0], sizes = [1, 128], strides = [1, 1]} : vector<4x128xf32> to vector<1x128xf32>
    %c0_2 = arith.constant 0 : index
    %c4_3 = arith.constant 4 : index
    %4 = memref.load %arg1[%c0_2, %c4_3] : memref<5x5xf32, #tpu.memory_space<smem>>
    %5 = vector.broadcast %4 : f32 to vector<1x128xf32>
    %6 = arith.mulf %5, %3 : vector<1x128xf32>
    %7 = arith.addf %2, %6 : vector<1x128xf32>
    %c0_4 = arith.constant 0 : index
    %c0_5 = arith.constant 0 : index
    %8 = memref.load %arg1[%c0_4, %c0_5] : memref<5x5xf32, #tpu.memory_space<smem>>
    %9 = vector.broadcast %8 : f32 to vector<1x128xf32>
    %10 = arith.mulf %9, %3 : vector<1x128xf32>
    %11 = vector.extract_strided_slice %0 {offsets = [0, 0], sizes = [1, 128], strides = [1, 1]} : vector<4x128xf32> to vector<1x128xf32>
    %12 = arith.mulf %10, %11 : vector<1x128xf32>
    %13 = arith.addf %7, %12 : vector<1x128xf32>
    %c0_6 = arith.constant 0 : index
    %c1 = arith.constant 1 : index
    %14 = memref.load %arg1[%c0_6, %c1] : memref<5x5xf32, #tpu.memory_space<smem>>
    %15 = vector.broadcast %14 : f32 to vector<1x128xf32>
    %16 = arith.mulf %15, %3 : vector<1x128xf32>
    %17 = vector.extract_strided_slice %0 {offsets = [1, 0], sizes = [1, 128], strides = [1, 1]} : vector<4x128xf32> to vector<1x128xf32>
    %18 = arith.mulf %16, %17 : vector<1x128xf32>
    %19 = arith.addf %13, %18 : vector<1x128xf32>
    %c0_7 = arith.constant 0 : index
    %c2 = arith.constant 2 : index
    %20 = memref.load %arg1[%c0_7, %c2] : memref<5x5xf32, #tpu.memory_space<smem>>
    %21 = vector.broadcast %20 : f32 to vector<1x128xf32>
    %22 = arith.mulf %21, %3 : vector<1x128xf32>
    %23 = vector.extract_strided_slice %0 {offsets = [2, 0], sizes = [1, 128], strides = [1, 1]} : vector<4x128xf32> to vector<1x128xf32>
    %24 = arith.mulf %22, %23 : vector<1x128xf32>
    %25 = arith.addf %19, %24 : vector<1x128xf32>
    %c0_8 = arith.constant 0 : index
    %c3 = arith.constant 3 : index
    %26 = memref.load %arg1[%c0_8, %c3] : memref<5x5xf32, #tpu.memory_space<smem>>
    %27 = vector.broadcast %26 : f32 to vector<1x128xf32>
    %28 = arith.mulf %27, %3 : vector<1x128xf32>
    %29 = vector.extract_strided_slice %0 {offsets = [3, 0], sizes = [1, 128], strides = [1, 1]} : vector<4x128xf32> to vector<1x128xf32>
    %30 = arith.mulf %28, %29 : vector<1x128xf32>
    %31 = arith.addf %25, %30 : vector<1x128xf32>
    %32 = vector.extract_strided_slice %0 {offsets = [1, 0], sizes = [1, 128], strides = [1, 1]} : vector<4x128xf32> to vector<1x128xf32>
    %c1_9 = arith.constant 1 : index
    %c4_10 = arith.constant 4 : index
    %33 = memref.load %arg1[%c1_9, %c4_10] : memref<5x5xf32, #tpu.memory_space<smem>>
    %34 = vector.broadcast %33 : f32 to vector<1x128xf32>
    %35 = arith.mulf %34, %32 : vector<1x128xf32>
    %36 = arith.addf %31, %35 : vector<1x128xf32>
    %c1_11 = arith.constant 1 : index
    %c1_12 = arith.constant 1 : index
    %37 = memref.load %arg1[%c1_11, %c1_12] : memref<5x5xf32, #tpu.memory_space<smem>>
    %38 = vector.broadcast %37 : f32 to vector<1x128xf32>
    %39 = arith.mulf %38, %32 : vector<1x128xf32>
    %40 = vector.extract_strided_slice %0 {offsets = [1, 0], sizes = [1, 128], strides = [1, 1]} : vector<4x128xf32> to vector<1x128xf32>
    %41 = arith.mulf %39, %40 : vector<1x128xf32>
    %42 = arith.addf %36, %41 : vector<1x128xf32>
    %c1_13 = arith.constant 1 : index
    %c2_14 = arith.constant 2 : index
    %43 = memref.load %arg1[%c1_13, %c2_14] : memref<5x5xf32, #tpu.memory_space<smem>>
    %44 = vector.broadcast %43 : f32 to vector<1x128xf32>
    %45 = arith.mulf %44, %32 : vector<1x128xf32>
    %46 = vector.extract_strided_slice %0 {offsets = [2, 0], sizes = [1, 128], strides = [1, 1]} : vector<4x128xf32> to vector<1x128xf32>
    %47 = arith.mulf %45, %46 : vector<1x128xf32>
    %48 = arith.addf %42, %47 : vector<1x128xf32>
    %c1_15 = arith.constant 1 : index
    %c3_16 = arith.constant 3 : index
    %49 = memref.load %arg1[%c1_15, %c3_16] : memref<5x5xf32, #tpu.memory_space<smem>>
    %50 = vector.broadcast %49 : f32 to vector<1x128xf32>
    %51 = arith.mulf %50, %32 : vector<1x128xf32>
    %52 = vector.extract_strided_slice %0 {offsets = [3, 0], sizes = [1, 128], strides = [1, 1]} : vector<4x128xf32> to vector<1x128xf32>
    %53 = arith.mulf %51, %52 : vector<1x128xf32>
    %54 = arith.addf %48, %53 : vector<1x128xf32>
    %55 = vector.extract_strided_slice %0 {offsets = [2, 0], sizes = [1, 128], strides = [1, 1]} : vector<4x128xf32> to vector<1x128xf32>
    %c2_17 = arith.constant 2 : index
    %c4_18 = arith.constant 4 : index
    %56 = memref.load %arg1[%c2_17, %c4_18] : memref<5x5xf32, #tpu.memory_space<smem>>
    %57 = vector.broadcast %56 : f32 to vector<1x128xf32>
    %58 = arith.mulf %57, %55 : vector<1x128xf32>
    %59 = arith.addf %54, %58 : vector<1x128xf32>
    %c2_19 = arith.constant 2 : index
    %c2_20 = arith.constant 2 : index
    %60 = memref.load %arg1[%c2_19, %c2_20] : memref<5x5xf32, #tpu.memory_space<smem>>
    %61 = vector.broadcast %60 : f32 to vector<1x128xf32>
    %62 = arith.mulf %61, %55 : vector<1x128xf32>
    %63 = vector.extract_strided_slice %0 {offsets = [2, 0], sizes = [1, 128], strides = [1, 1]} : vector<4x128xf32> to vector<1x128xf32>
    %64 = arith.mulf %62, %63 : vector<1x128xf32>
    %65 = arith.addf %59, %64 : vector<1x128xf32>
    %c2_21 = arith.constant 2 : index
    %c3_22 = arith.constant 3 : index
    %66 = memref.load %arg1[%c2_21, %c3_22] : memref<5x5xf32, #tpu.memory_space<smem>>
    %67 = vector.broadcast %66 : f32 to vector<1x128xf32>
    %68 = arith.mulf %67, %55 : vector<1x128xf32>
    %69 = vector.extract_strided_slice %0 {offsets = [3, 0], sizes = [1, 128], strides = [1, 1]} : vector<4x128xf32> to vector<1x128xf32>
    %70 = arith.mulf %68, %69 : vector<1x128xf32>
    %71 = arith.addf %65, %70 : vector<1x128xf32>
    %72 = vector.extract_strided_slice %0 {offsets = [3, 0], sizes = [1, 128], strides = [1, 1]} : vector<4x128xf32> to vector<1x128xf32>
    %c3_23 = arith.constant 3 : index
    %c4_24 = arith.constant 4 : index
    %73 = memref.load %arg1[%c3_23, %c4_24] : memref<5x5xf32, #tpu.memory_space<smem>>
    %74 = vector.broadcast %73 : f32 to vector<1x128xf32>
    %75 = arith.mulf %74, %72 : vector<1x128xf32>
    %76 = arith.addf %71, %75 : vector<1x128xf32>
    %c3_25 = arith.constant 3 : index
    %c3_26 = arith.constant 3 : index
    %77 = memref.load %arg1[%c3_25, %c3_26] : memref<5x5xf32, #tpu.memory_space<smem>>
    %78 = vector.broadcast %77 : f32 to vector<1x128xf32>
    %79 = arith.mulf %78, %72 : vector<1x128xf32>
    %80 = vector.extract_strided_slice %0 {offsets = [3, 0], sizes = [1, 128], strides = [1, 1]} : vector<4x128xf32> to vector<1x128xf32>
    %81 = arith.mulf %79, %80 : vector<1x128xf32>
    %82 = arith.addf %76, %81 : vector<1x128xf32>
    %c0_27 = arith.constant 0 : index
    %c0_28 = arith.constant 0 : index
    %83 = vector.load %arg3[%c0_27, %c0_28] : memref<1x128xf32, #tpu.memory_space<vmem>>, vector<1x128xf32>
    tpu.vector_store %arg3[%c0_27, %c0_28], %82 {strides = array<i32>} : memref<1x128xf32, #tpu.memory_space<vmem>>, vector<1x128xf32>,
    return
  }
  func.func @transform_0(%arg0: i32) -> (i32, i32) {
    %c0_i32 = arith.constant 0 : i32
    %c0_i32_0 = arith.constant 0 : i32
    %c0_i32_1 = arith.constant 0 : i32
    return %c0_i32, %c0_i32_0 : i32, i32
  }
  func.func @transform_1(%arg0: i32) -> (i32, i32) {
    %c0_i32 = arith.constant 0 : i32
    %c0_i32_0 = arith.constant 0 : i32
    return %c0_i32, %arg0 : i32, i32
  }
  func.func @transform_2(%arg0: i32) -> (i32, i32) {
    %c0_i32 = arith.constant 0 : i32
    %c0_i32_0 = arith.constant 0 : i32
    return %c0_i32, %arg0 : i32, i32
  }
}

</mosaic_0001>

<bundles_post_ra>
// kernel: tpu_custom_call.1
= control target key start
LH: loop header
LB: loop body
LE: loop exit
PB: predicated region body
PF: predicated region fallthrough
CT: control target
= control target key end

     0   :  { %7 = vsyncpa [#allocation5], 0  ;;  %s297_s0 = inlined_call_operand.hbm [shape: f32[5,5], index: 0, kind: input, shape index: {}]   ;;  %s298_s1 = inlined_call_operand.hbm [shape: f32[4,128], index: 1, kind: input, shape index: {}]   ;;  %s299_s2 = inlined_call_operand.hbm [shape: f32[1,128], index: 2, kind: output, shape index: {}]  }
   0x1   :  { %8 = vsyncpa [#allocation3], 0 }
   0x2   :  { %9 = vsyncpa [#allocation4], 0  ;;  %s15_s11 = sshll.u32 %s297_s0, 4  ;;  %s24_s14 = sshll.u32 %s298_s1, 4  ;;  %s16_s11 = int_to_ptr.hbm [resolvable:$true] %s15_s11  ;;  %s25_s14 = int_to_ptr.hbm [resolvable:$true] %s24_s14 }
   0x3   :  { %s244_s15 = smov [#allocation2]   ;;  %s245_s16 = smov [#allocation6]  }
   0x4   :  { %18 = dma.hbm_to_smem %s16_s11, 128, %s244_s15, [#allocation5]  }
   0x5   :  { %s26_s17 = sshll.u32 %s245_s16, 4  ;;  %s27_s17 = int_to_ptr.vmem [resolvable:$true] %s26_s17 }
   0x6   :  { %29 = dma.hbm_to_vmem [thread:$0]  %s25_s14, 64, %s27_s17, [#allocation3]  }
   0x7   :  { %238 = dma.done.wait [#allocation5], 128  }
   0x8   :  { %239 = vsyncadd [#allocation5], 4294967168 }
   0x9   :  { %240 = dma.done.wait [#allocation3], 64  }
   0xa   :  { %241 = vsyncadd [#allocation3], 4294967232 }
   0xb   :  { %38 = sfence }
   0xc   :  { %s161_s18 = sld [smem:[#allocation2 + $0x204]]  ;;  %v268_v0 = vld [vmem:[#allocation6] sm:$0xf]  ;;  %s246_s3 = smov [#allocation7]  }
   0xd   :  { %s162_s19 = sld [smem:[#allocation2 + $0x4]]  ;;  %v55_v5 = vrot.slane %v268_v0, 1  ;;  %v62_v8 = vrot.slane %v268_v0, 2  ;;  %v69_v15 = vrot.slane %v268_v0, 3  ;;  %s148_s4 = sshll.u32 %s246_s3, 4  ;;  %s149_s4 = int_to_ptr.vmem [resolvable:$true] %s148_s4 }
   0xe   :  { %s46_s0 = sld [smem:[#allocation2]]  ;;  %s150_s7 = sshll.u32 %s299_s2, 4  ;;  %s151_s7 = int_to_ptr.hbm [resolvable:$true] %s150_s7 }
   0xf   :  { %s163_s20 = sld [smem:[#allocation2 + $0x1]] }
  0x10   :  { %s164_s21 = sld [smem:[#allocation2 + $0x2]] }
  0x11   :  { %s165_s1 = sld [smem:[#allocation2 + $0x3]] }
  0x12   :  { %s166_s22 = sld [smem:[#allocation2 + $0x84]]  ;;  %v41_v1 = vstv %s161_s18 }
  0x13   :  { %v43_v2 = vstv %s162_s19  ;;  %s167_s23 = sld [smem:[#allocation2 + $0x81]] }
  0x14   :  { %v44_v3 = vmul.f32 %v43_v2, %v268_v0  ;;  %v47_v4 = vstv %s46_s0  ;;  %s168_s24 = sld [smem:[#allocation2 + $0x82]] }
  0x15   :  { %v48_v6 = vmul.f32 %v47_v4, %v268_v0  ;;  %v52_v7 = vstv %s163_s20  ;;  %s169_s25 = sld [smem:[#allocation2 + $0x83]] }
  0x16   :  { %v45_v9 = vadd.f32 %v44_v3, %v41_v1  ;;  %v53_v10 = vmul.f32 %v52_v7, %v268_v0  ;;  %v60_v11 = vstv %s164_s21  ;;  %s275_s26 = sld [smem:[#allocation2 + $0x104]] }
  0x17   :  { %v49_v12 = vmul.f32 %v48_v6, %v268_v0  ;;  %v61_v13 = vmul.f32 %v60_v11, %v268_v0  ;;  %v67_v14 = vstv %s165_s1  ;;  %s171_s27 = sld [smem:[#allocation2 + $0x102]] }
  0x18   :  { %v57_v16 = vmul.f32 %v55_v5, %v53_v10  ;;  %v68_v17 = vmul.f32 %v67_v14, %v268_v0  ;;  %v74_v18 = vstv %s166_s22  ;;  %s172_s28 = sld [smem:[#allocation2 + $0x103]] }
  0x19   :  { %v50_v19 = vadd.f32 %v49_v12, %v45_v9  ;;  %v64_v20 = vmul.f32 %v62_v8, %v61_v13  ;;  %v75_v21 = vmul.f32 %v74_v18, %v268_v0  ;;  %v81_v22 = vstv %s167_s23  ;;  %s174_s29 = sld [smem:[#allocation2 + $0x183]] }
  0x1a   :  { %v82_v23 = vmul.f32 %v81_v22, %v268_v0  ;;  %v89_v24 = vstv %s168_s24  ;;  %v71_v26 = vmul.f32 %v69_v15, %v68_v17  ;;  %s173_s30 = sld [smem:[#allocation2 + $0x184]] }
  0x1b   :  { %v58_v25 = vadd.f32 %v57_v16, %v50_v19  ;;  %v90_v27 = vmul.f32 %v89_v24, %v268_v0  ;;  %v97_v28 = vstv %s169_s25  ;;  %v77_v32 = vrot.slane %v75_v21, 1 }
  0x1c   :  { %v83_v29 = vmul.f32 %v82_v23, %v268_v0  ;;  %v98_v30 = vmul.f32 %v97_v28, %v268_v0  ;;  %v105_v35 = vstv %s275_s26 }
  0x1d   :  { %v65_v31 = vadd.f32 %v64_v20, %v58_v25  ;;  %v91_v33 = vmul.f32 %v90_v27, %v55_v5  ;;  %v112_v34 = vstv %s171_s27  ;;  %v106_v43 = vmul.f32 %v105_v35, %v268_v0 }
  0x1e   :  { %v120_v36 = vstv %s172_s28  ;;  %v85_v38 = vrot.slane %v83_v29, 1  ;;  %v99_v39 = vmul.f32 %v98_v30, %v62_v8  ;;  %v113_v40 = vmul.f32 %v112_v34, %v268_v0 }
  0x1f   :  { %v72_v37 = vadd.f32 %v71_v26, %v65_v31  ;;  %v93_v42 = vrot.slane %v91_v33, 1  ;;  %v121_v44 = vmul.f32 %v120_v36, %v268_v0  ;;  %v135_v45 = vstv %s174_s29 }
  0x20   :  { %v101_v47 = vrot.slane %v99_v39, 1  ;;  %v114_v48 = vmul.f32 %v113_v40, %v268_v0  ;;  %v128_v49 = vstv %s173_s30  ;;  %v108_v51 = vrot.slane %v106_v43, 2 }
  0x21   :  { %v79_v41 = vadd.f32 %v77_v32, %v72_v37  ;;  %v122_v52 = vmul.f32 %v121_v44, %v55_v5  ;;  %v136_v53 = vmul.f32 %v135_v45, %v268_v0  ;;  %v129_v56 = vmul.f32 %v128_v49, %v268_v0 }
  0x22   :  { %v116_v55 = vrot.slane %v114_v48, 2 }
  0x23   :  { %v87_v46 = vadd.f32 %v85_v38, %v79_v41  ;;  %v124_v58 = vrot.slane %v122_v52, 2  ;;  %v137_v59 = vmul.f32 %v136_v53, %v268_v0  ;;  %v131_v61 = vrot.slane %v129_v56, 3 }
  0x25   :  { %v95_v50 = vadd.f32 %v93_v42, %v87_v46  ;;  %v139_v63 = vrot.slane %v137_v59, 3 }
  0x27   :  { %v103_v54 = vadd.f32 %v101_v47, %v95_v50 }
  0x29   :  { %v110_v57 = vadd.f32 %v108_v51, %v103_v54 }
  0x2b   :  { %v118_v60 = vadd.f32 %v116_v55, %v110_v57 }
  0x2d   :  { %v126_v62 = vadd.f32 %v124_v58, %v118_v60 }
  0x2f   :  { %v133_v1 = vadd.f32 %v131_v61, %v126_v62 }
  0x31   :  { %v141_v2 = vadd.f32 %v139_v63, %v133_v1 }
  0x33   :  { %142 = vst [vmem:[#allocation7] sm:$0x1] %v141_v2 }
  0x34   :  { %153 = dma.vmem_to_hbm [thread:$0]  %s149_s4, 16, %s151_s7, [#allocation4]  }
  0x35   :  { %242 = dma.done.wait [#allocation4], 16  }
  0x36   :  { %243 = vsyncadd [#allocation4], 4294967280 }
  0x37   :  { %158 = vsyncpa [#allocation3], 1 }
  0x38   :  { %159 = vsyncpa [#allocation4], 1 }
  0x39   :  { %160 = vsyncpa [#allocation5], 1 }

</bundles_post_ra>
